<compile_context>
chip_gen: v6e
topology: v6e:2x2x1
jax: 0.10.0
libtpu: 0.0.40
codegen_flags: <defaults>
</compile_context>

<pallas_src>
import math

import jax
import jax.numpy as jnp
from jax.experimental import pallas as pl
from jax.experimental.pallas import tpu as pltpu


def _expon_kernel(x_ref, o_ref):
    # Elementwise exp on the current VMEM tile. The transcendental runs on the
    # EUP (its own VLIW slot) — this kernel is HBM-bandwidth bound, so the only
    # thing that matters is wide contiguous DMAs and unmasked stores.
    o_ref[...] = jnp.exp(x_ref[...])


def _round_up(a: int, b: int) -> int:
    return ((a + b - 1) // b) * b


def expon(
    x: jax.Array,
    *,
    lanes: int = 2048,
    target_block_bytes: int = 4 * 1024 * 1024,
    min_kernel_elems: int = 1 << 20,
) -> jax.Array:
    """Element-wise exp (same semantics as torch.exp) via a Pallas TPU kernel."""
    orig_shape = x.shape
    n = x.size

    # torch.exp promotes integer/bool inputs to floating point.
    if jnp.issubdtype(x.dtype, jnp.floating):
        compute_dtype = x.dtype
    else:
        compute_dtype = jnp.float32
    if x.dtype != compute_dtype:
        x = x.astype(compute_dtype)

    # Fast path: empty / tiny inputs — kernel dispatch overhead would dwarf the work.
    if n == 0 or n < min_kernel_elems:
        return jnp.exp(x)

    itemsize = jnp.dtype(compute_dtype).itemsize
    flat = x.reshape(-1)  # row-major reshape: free (bitcast) in XLA.

    # Lane width C: a multiple of 128, as wide as possible (<= lanes) while
    # dividing n exactly so no padding copy is needed.
    if n % 128 == 0:
        C = 128 * math.gcd(n // 128, lanes // 128)
        n_pad = n
    else:
        # Rare ragged case: minimal pad (< 128 elems) to make the reshape legal.
        C = 128
        n_pad = _round_up(n, 128)
        flat = jnp.pad(flat, (0, n_pad - n))
    rows = n_pad // C
    slab = flat.reshape(rows, C)

    # Row tile: ~target_block_bytes per block, shrunk so the grid keeps >= ~16
    # steps when the input allows. Sublane multiple of 32 covers f32/bf16/i8
    # packing; tiny inputs just take the full (exact) row extent.
    sublane = 32
    if rows <= sublane:
        tile_rows = rows  # equal to full dim -> always a legal block shape
    else:
        tile_rows = max(sublane, target_block_bytes // (C * itemsize))
        tile_for_steps = _round_up(max(1, pl.cdiv(rows, 16)), sublane)
        tile_rows = _round_up(min(tile_rows, tile_for_steps), sublane)

    grid = (pl.cdiv(rows, tile_rows),)

    out = pl.pallas_call(
        _expon_kernel,
        out_shape=jax.ShapeDtypeStruct((rows, C), compute_dtype),
        grid_spec=pltpu.PrefetchScalarGridSpec(
            num_scalar_prefetch=0,
            grid=grid,
            in_specs=[pl.BlockSpec((tile_rows, C), lambda i: (i, 0))],
            out_specs=pl.BlockSpec((tile_rows, C), lambda i: (i, 0)),
        ),
        compiler_params=pltpu.CompilerParams(
            dimension_semantics=("parallel",),
        ),
        cost_estimate=pl.CostEstimate(
            flops=0,
            transcendentals=n,
            bytes_accessed=2 * n * itemsize,
        ),
    )(slab)

    if n_pad != n:
        return out.reshape(-1)[:n].reshape(orig_shape)
    return out.reshape(orig_shape)


if __name__ == "__main__":
    key = jax.random.PRNGKey(0)
    k_small, k_big = jax.random.split(key)

    # Small shape consistent with (N, *): batch=2, channels=4, spatial=16x16.
    x = jax.random.normal(k_small, (2, 4, 16, 16), dtype=jnp.float32)
    y_ref = jnp.exp(x)

    # Force the Pallas kernel path at this small size (default dispatch would
    # take the jnp.exp fast path) so the kernel itself is compiled and run.
    y = jax.block_until_ready(expon(x, min_kernel_elems=0))
    assert y.shape == x.shape and y.dtype == x.dtype
    assert jnp.allclose(y, y_ref, rtol=1e-6, atol=1e-6), "mismatch vs jnp.exp (small)"

    # Default dispatch (fast path) also correct.
    y_fast = jax.block_until_ready(expon(x))
    assert jnp.allclose(y_fast, y_ref, rtol=1e-6, atol=1e-6), "mismatch (fast path)"

    # Moderate input exercising the default kernel path with a multi-step grid.
    xb = jax.random.normal(k_big, (1024, 2048), dtype=jnp.float32)
    yb = jax.block_until_ready(expon(xb))
    assert jnp.allclose(yb, jnp.exp(xb), rtol=1e-6, atol=1e-6), "mismatch vs jnp.exp (big)"

    print("KERNEL_OK")
</pallas_src>

<mosaic_0001>
module attributes {stable_mosaic.version = 11 : i64} {
  func.func @_expon_kernel(%arg0: i32, %arg1: memref<1x2048xf32, #tpu.memory_space<vmem>>, %arg2: memref<1x2048xf32, #tpu.memory_space<vmem>>) attributes {dimension_semantics = [#tpu.dimension_semantics<parallel>], iteration_bounds = array<i64: 1>, scalar_prefetch = 0 : i64, scratch_operands = 0 : i64, tpu.core_type = #tpu.core_type<tc>, window_params = [{transform_indices = @transform_0, window_bounds = array<i64: 1, 2048>}, {transform_indices = @transform_1, window_bounds = array<i64: 1, 2048>}]} {
    %c0 = arith.constant 0 : index
    %c0_0 = arith.constant 0 : index
    %0 = vector.load %arg1[%c0, %c0_0] : memref<1x2048xf32, #tpu.memory_space<vmem>>, vector<1x2048xf32>
    %1 = math.exp %0 : vector<1x2048xf32>
    %c0_1 = arith.constant 0 : index
    %c0_2 = arith.constant 0 : index
    %2 = vector.load %arg2[%c0_1, %c0_2] : memref<1x2048xf32, #tpu.memory_space<vmem>>, vector<1x2048xf32>
    tpu.vector_store %arg2[%c0_1, %c0_2], %1 {strides = array<i32>} : memref<1x2048xf32, #tpu.memory_space<vmem>>, vector<1x2048xf32>,
    return
  }
  func.func @transform_0(%arg0: i32) -> (i32, i32) {
    %c0_i32 = arith.constant 0 : i32
    %c0_i32_0 = arith.constant 0 : i32
    return %arg0, %c0_i32 : i32, i32
  }
  func.func @transform_1(%arg0: i32) -> (i32, i32) {
    %c0_i32 = arith.constant 0 : i32
    %c0_i32_0 = arith.constant 0 : i32
    return %arg0, %c0_i32 : i32, i32
  }
}

</mosaic_0001>

<bundles_post_ra>
// kernel: tpu_custom_call.1
= control target key start
LH: loop header
LB: loop body
LE: loop exit
PB: predicated region body
PF: predicated region fallthrough
CT: control target
= control target key end

     0   :  { %6 = vsyncpa [#allocation3], 0  ;;  %s112_s0 = inlined_call_operand.hbm [shape: f32[1,2048], index: 0, kind: input, shape index: {}]   ;;  %s113_s1 = inlined_call_operand.hbm [shape: f32[1,2048], index: 1, kind: output, shape index: {}]  }
   0x1   :  { %7 = vsyncpa [#allocation4], 0  ;;  %s94_s6 = smov [#allocation2]  }
   0x2   :  { %s14_s7 = sshll.u32 %s94_s6, 4  ;;  %s15_s7 = int_to_ptr.vmem [resolvable:$true] %s14_s7 }
   0x3   :  { %s58_s8 = scalar_lea.vmem %s15_s7, 256  ;;  %p63_p1 = scmp.lt.s32.totalorder %s15_s7, %s15_s7 }
   0x4   :  { %p59_p0 = scmp.ne.s32.totalorder %s15_s7, %s58_s8  ;;  %p64_p2 = scmp.lt.s32.totalorder %s58_s8, %s58_s8 }
   0x6   :  { %p65_p3 = por %p64_p2, %p63_p1 }
   0x8   :  { %p66_p4 = pnand %p65_p3, %p59_p0 }
   0xa   :  { %69 = shalt.err (!%p66_p4)
}
   0xb   :  { %17 = dma.hbm_to_vmem [thread:$0]  %s112_s0, 256, %s15_s7, [#allocation3]  }
   0xc   :  { %90 = dma.done.wait [#allocation3], 256  }
   0xd   :  { %91 = vsyncadd [#allocation3], 4294967040  ;;  %v21_v0 = vld [vmem:[#allocation2] sm:$0xff]  ;;  %v22_v1 = vld [vmem:[#allocation2 + $0x8] sm:$0xff]  ;;  %s95_s11 = smov [#allocation5]  }
   0xe   :  { %v23_v2 = vmul.f32 1.442695, %v21_v0  ;;  %v25_v3 = vmul.f32 1.442695, %v22_v1  ;;  %s35_s12 = sshll.u32 %s95_s11, 4  ;;  %s36_s12 = int_to_ptr.vmem [resolvable:$true] %s35_s12 }
   0xf   :  { %s70_s13 = scalar_lea.vmem %s36_s12, 256  ;;  %p75_p6 = scmp.lt.s32.totalorder %s36_s12, %s36_s12 }
  0x10   :  { %46 = vpow2.f32 %v23_v2  ;;  %p71_p5 = scmp.ne.s32.totalorder %s36_s12, %s70_s13  ;;  %p76_p7 = scmp.lt.s32.totalorder %s70_s13, %s70_s13 }
  0x11   :  { %48 = vpow2.f32 %v25_v3 }
  0x12   :  { %p77_p8 = por %p76_p7, %p75_p6 }
  0x14   :  { %p78_p9 = pnand %p77_p8, %p71_p5 }
  0x1d   :  { %v47_v4 = vpop.eup %46 }
  0x1e   :  { %v49_v5 = vpop.eup %48  ;;  %27 = vst [vmem:[#allocation5] sm:$0xff] %v47_v4 }
  0x1f   :  { %28 = vst [vmem:[#allocation5 + $0x8] sm:$0xff] %v49_v5 }
  0x20   :  { %81 = shalt.err (!%p78_p9)
}
  0x21   :  { %38 = dma.vmem_to_hbm [thread:$0]  %s36_s12, 256, %s113_s1, [#allocation4]  }
  0x22   :  { %92 = dma.done.wait [#allocation4], 256  }
  0x23   :  { %93 = vsyncadd [#allocation4], 4294967040 }
  0x24   :  { %42 = vsyncpa [#allocation3], 1 }
  0x25   :  { %43 = vsyncpa [#allocation4], 1 }

</bundles_post_ra>
